<compile_context>
chip_gen: v7x
topology: tpu7x:2x2x1
jax: 0.10.0
libtpu: 0.0.40
codegen_flags: <defaults>
</compile_context>

<pallas_src>
import jax
import jax.numpy as jnp
from jax.experimental import pallas as pl
from jax.experimental.pallas import tpu as pltpu

CRAZY_NEGATIVE_VALUE = -5000.0
B_AVG = (19 + 9) / 2
B_VARIANCE = 0.1

_MIN_TILE_BYTES = 512 * 1024          # don't shrink x tiles below ~512 KiB
_MIN_GRID_STEPS = 8                   # >=4 steps per TC on v7x (2 TCs)
_VMEM_BUDGET_BYTES = 40 * 1024 * 1024 # stay under the 48 MiB scoped limit below
_VMEM_LIMIT_BYTES = 48 * 1024 * 1024  # < v7x's 64 MiB physical per TC

_target_tile_bytes_cache = None


def _target_tile_bytes():
    """Per-generation x-tile target (HBM roofline vs 0.35us/step overhead)."""
    global _target_tile_bytes_cache
    if _target_tile_bytes_cache is None:
        try:
            kind = jax.devices()[0].device_kind.lower()
        except Exception:
            kind = ""
        # v7x: 3.2 TB/s HBM -> need ~8 MiB tiles to keep step overhead <10%.
        # v6e/v5e: 4 MiB is plenty.
        _target_tile_bytes_cache = (8 * 1024 * 1024 if "v7" in kind
                                    else 4 * 1024 * 1024)
    return _target_tile_bytes_cache


def _round_up(n, m):
    return ((n + m - 1) // m) * m


def _pick_batch_tile(b, c, hw, itemsize, with_mask):
    """Rows per grid step: big enough for the HBM roofline, small enough for VMEM."""
    hw_pad = _round_up(hw, 128)                       # lane padding
    x_row = c * hw_pad * itemsize                     # one batch row of x in VMEM
    mask_row = 8 * hw_pad * itemsize if with_mask else 0  # (1, hw) pads to 8 sublanes
    # Live VMEM per row: 2 x-buffers (double buffering) + 1 native-dtype select
    # temporary (policy only) + 2 mask buffers.  Output / coef are negligible.
    live_row = (3 if with_mask else 2) * x_row + 2 * mask_row

    bt_target = max(1, _target_tile_bytes() // max(x_row, 1))
    bt_vmem = max(1, _VMEM_BUDGET_BYTES // max(live_row, 1))
    bt = min(b, bt_target, bt_vmem)

    # Prefer >= _MIN_GRID_STEPS grid steps (megacore sharding / pipeline ramp),
    # but never drop x tiles below ~2*_MIN_TILE_BYTES before halving.
    while (pl.cdiv(b, bt) < _MIN_GRID_STEPS and bt > 1
           and bt * x_row > 2 * _MIN_TILE_BYTES):
        bt = max(1, bt // 2)

    # 2-D coef/out blocks put bt on the sublane axis: keep it 8-aligned unless
    # it covers the whole batch.
    if bt < b:
        bt = max(8, (bt // 8) * 8) if b > 8 else b
    return min(bt, b)


def _global_pool_kernel_policy(coef_ref, x_ref, mask_ref, out_ref):
    # coef_ref: (bt, 3) f32   [1/div, b_diff/(10*div), unused]
    # x_ref   : (bt, c, hw)   native dtype
    # mask_ref: (bt, 1, hw)   native dtype
    # out_ref : (bt, 3*c) f32
    x = x_ref[...]
    s = jnp.sum(x, axis=2, dtype=jnp.float32)           # (bt, c), f32 accumulation
    coef = coef_ref[...]                                 # (bt, 3)
    mean = s * coef[:, 0:1]                              # layer0
    mean_b = s * coef[:, 1:2]                            # layer1
    # Masked max as one native-dtype select + cross-lane max (XLU); only the
    # small (bt, c) result is upcast.  See module docstring for the semantics
    # caveat vs. the add form.
    masked = jnp.where(mask_ref[...] != 0, x, CRAZY_NEGATIVE_VALUE)
    mx = jnp.max(masked, axis=2).astype(jnp.float32)     # layer2
    out_ref[...] = jnp.concatenate([mean, mean_b, mx], axis=-1)


def _global_pool_kernel_value(coef_ref, x_ref, out_ref):
    # coef_ref: (bt, 3) f32   [1/div, b_diff/(10*div), (b_diff^2/100 - 0.1)/div]
    s = jnp.sum(x_ref[...], axis=2, dtype=jnp.float32)   # (bt, c)
    coef = coef_ref[...]
    out_ref[...] = jnp.concatenate(
        [s * coef[:, 0:1], s * coef[:, 1:2], s * coef[:, 2:3]], axis=-1)


def global_pool(x, mask, mask_sum_hw, mask_sum_hw_sqrt, *, is_value_head=False):
    """Pallas implementation of GlobalPool.forward.

    x:                (b, c, h, w)   (f32 or bf16)
    mask:             (b, 1, h, w)
    mask_sum_hw:      (b,)
    mask_sum_hw_sqrt: (b,)
    returns:          (b, 3*c) float32
    """
    b, c, h, w = x.shape
    hw = h * w
    # Native dtype all the way to the kernel (no extra HBM pass for upcasts).
    x2 = x.reshape(b, c, hw)
    m2 = mask.reshape(b, 1, hw)

    div = mask_sum_hw.reshape(b).astype(jnp.float32)
    div_sqrt = mask_sum_hw_sqrt.reshape(b).astype(jnp.float32)
    b_diff = div_sqrt - B_AVG
    inv_div = 1.0 / div
    coef = jnp.stack(
        [inv_div,
         inv_div * (b_diff / 10.0),
         inv_div * (jnp.square(b_diff) / 100.0 - B_VARIANCE)],
        axis=-1,
    )  # (b, 3) lane-dense

    bt = _pick_batch_tile(b, c, hw, x2.dtype.itemsize, with_mask=not is_value_head)
    grid = (pl.cdiv(b, bt),)

    # NOTE: when b % bt != 0 the last block reads padded/garbage coef & x rows;
    # the corresponding output rows are discarded, so any inf/NaN produced
    # there is harmless.  Do not "fix" by asserting finiteness.
    coef_spec = pl.BlockSpec((bt, 3), lambda i: (i, 0))
    x_spec = pl.BlockSpec((bt, c, hw), lambda i: (i, 0, 0))
    out_spec = pl.BlockSpec((bt, 3 * c), lambda i: (i, 0))
    out_shape = jax.ShapeDtypeStruct((b, 3 * c), jnp.float32)
    cparams = pltpu.CompilerParams(
        dimension_semantics=("parallel",),
        vmem_limit_bytes=_VMEM_LIMIT_BYTES,
    )

    if is_value_head:
        # No mask needed for the value head -> drop its DMA entirely.
        out = pl.pallas_call(
            _global_pool_kernel_value,
            out_shape=out_shape,
            grid=grid,
            in_specs=[coef_spec, x_spec],
            out_specs=out_spec,
            compiler_params=cparams,
        )(coef, x2)
    else:
        mask_spec = pl.BlockSpec((bt, 1, hw), lambda i: (i, 0, 0))
        out = pl.pallas_call(
            _global_pool_kernel_policy,
            out_shape=out_shape,
            grid=grid,
            in_specs=[coef_spec, x_spec, mask_spec],
            out_specs=out_spec,
            compiler_params=cparams,
        )(coef, x2, m2)

    return out  # already (b, 3*c), matching torch.cat(..., dim=1)


def global_pool_ref(x, mask, mask_sum_hw, mask_sum_hw_sqrt, is_value_head=False):
    """Pure-JAX reference mirroring the PyTorch forward exactly."""
    b, c, h, w = x.shape
    xf = x.astype(jnp.float32)
    div = mask_sum_hw.reshape(-1, 1).astype(jnp.float32)
    div_sqrt = mask_sum_hw_sqrt.reshape(-1, 1).astype(jnp.float32)
    layer_raw_mean = jnp.sum(xf, axis=(2, 3)) / div
    b_diff = div_sqrt - B_AVG
    layer0 = layer_raw_mean
    layer1 = layer_raw_mean * (b_diff / 10.0)
    if is_value_head:
        layer2 = layer_raw_mean * (jnp.square(b_diff) / 100.0 - B_VARIANCE)
    else:
        raw_x = xf + (1.0 - mask.astype(jnp.float32)) * CRAZY_NEGATIVE_VALUE
        layer2 = jnp.max(raw_x.reshape(b, c, h * w), axis=2)
    return jnp.concatenate([layer0, layer1, layer2], axis=1)


if __name__ == "__main__":
    key = jax.random.PRNGKey(0)
    b, c, h, w = 2, 4, 16, 16

    x = jax.random.normal(key, (b, c, h, w), dtype=jnp.float32)

    # Batch 0: full 16x16 board active; batch 1: 9x9 sub-board active.
    mask = jnp.zeros((b, 1, h, w), jnp.float32)
    mask = mask.at[0, 0, :, :].set(1.0)
    mask = mask.at[1, 0, :9, :9].set(1.0)
    mask_sum_hw = jnp.sum(mask, axis=(1, 2, 3))          # (b,)
    mask_sum_hw_sqrt = jnp.sqrt(mask_sum_hw)             # (b,)

    # Policy / trunk head variant (is_value_head=False)
    out = jax.block_until_ready(
        global_pool(x, mask, mask_sum_hw, mask_sum_hw_sqrt, is_value_head=False))
    ref = global_pool_ref(x, mask, mask_sum_hw, mask_sum_hw_sqrt, False)
    assert out.shape == (b, 3 * c)
    assert jnp.allclose(out, ref, atol=1e-5, rtol=1e-5), "mismatch (policy head)"

    # Value-head variant (is_value_head=True)
    out_v = jax.block_until_ready(
        global_pool(x, mask, mask_sum_hw, mask_sum_hw_sqrt, is_value_head=True))
    ref_v = global_pool_ref(x, mask, mask_sum_hw, mask_sum_hw_sqrt, True)
    assert jnp.allclose(out_v, ref_v, atol=1e-5, rtol=1e-5), "mismatch (value head)"

    print("KERNEL_OK")
</pallas_src>

<mosaic_0001>
module attributes {stable_mosaic.version = 11 : i64} {
  func.func @_global_pool_kernel_policy(%arg0: i32, %arg1: memref<2x3xf32, #tpu.memory_space<vmem>>, %arg2: memref<2x4x256xf32, #tpu.memory_space<vmem>>, %arg3: memref<2x1x256xf32, #tpu.memory_space<vmem>>, %arg4: memref<2x12xf32, #tpu.memory_space<vmem>>) attributes {dimension_semantics = [#tpu.dimension_semantics<parallel>], iteration_bounds = array<i64: 1>, scalar_prefetch = 0 : i64, scratch_operands = 0 : i64, tpu.core_type = #tpu.core_type<tc>, window_params = [{transform_indices = @transform_0, window_bounds = array<i64: 2, 3>}, {transform_indices = @transform_1, window_bounds = array<i64: 2, 4, 256>}, {transform_indices = @transform_2, window_bounds = array<i64: 2, 1, 256>}, {transform_indices = @transform_3, window_bounds = array<i64: 2, 12>}]} {
    %c0 = arith.constant 0 : index
    %c0_0 = arith.constant 0 : index
    %c0_1 = arith.constant 0 : index
    %0 = vector.load %arg2[%c0, %c0_0, %c0_1] : memref<2x4x256xf32, #tpu.memory_space<vmem>>, vector<2x4x256xf32>
    %cst = arith.constant dense<0.000000e+00> : vector<2x4xf32>
    %1 = vector.multi_reduction <add>, %0, %cst [2] : vector<2x4x256xf32> to vector<2x4xf32>
    %c0_2 = arith.constant 0 : index
    %c0_3 = arith.constant 0 : index
    %2 = vector.load %arg1[%c0_2, %c0_3] : memref<2x3xf32, #tpu.memory_space<vmem>>, vector<2x3xf32>
    %3 = vector.extract_strided_slice %2 {offsets = [0, 0], sizes = [2, 1], strides = [1, 1]} : vector<2x3xf32> to vector<2x1xf32>
    %4 = vector.broadcast %3 : vector<2x1xf32> to vector<2x4xf32>
    %5 = arith.mulf %1, %4 : vector<2x4xf32>
    %6 = vector.extract_strided_slice %2 {offsets = [0, 1], sizes = [2, 1], strides = [1, 1]} : vector<2x3xf32> to vector<2x1xf32>
    %7 = vector.broadcast %6 : vector<2x1xf32> to vector<2x4xf32>
    %8 = arith.mulf %1, %7 : vector<2x4xf32>
    %c0_4 = arith.constant 0 : index
    %c0_5 = arith.constant 0 : index
    %c0_6 = arith.constant 0 : index
    %9 = vector.load %arg3[%c0_4, %c0_5, %c0_6] : memref<2x1x256xf32, #tpu.memory_space<vmem>>, vector<2x1x256xf32>
    %cst_7 = arith.constant 0.000000e+00 : f32
    %10 = vector.broadcast %cst_7 : f32 to vector<2x1x256xf32>
    %11 = arith.cmpf one, %9, %10 : vector<2x1x256xf32>
    %cst_8 = arith.constant -5.000000e+03 : f32
    %12 = vector.shape_cast %11 : vector<2x1x256xi1> to vector<2x1x256xi1>
    %13 = vector.broadcast %12 : vector<2x1x256xi1> to vector<2x4x256xi1>
    %14 = vector.broadcast %cst_8 : f32 to vector<2x4x256xf32>
    %15 = arith.select %13, %0, %14 : vector<2x4x256xi1>, vector<2x4x256xf32>
    %cst_9 = arith.constant dense<0xFF800000> : vector<2x4xf32>
    %16 = vector.multi_reduction <maximumf>, %15, %cst_9 [2] : vector<2x4x256xf32> to vector<2x4xf32>
    %17 = tpu.concatenate %5, %8, %16 in 1 : vector<2x4xf32>, vector<2x4xf32>, vector<2x4xf32> -> vector<2x12xf32>
    %c0_10 = arith.constant 0 : index
    %c0_11 = arith.constant 0 : index
    %18 = vector.load %arg4[%c0_10, %c0_11] : memref<2x12xf32, #tpu.memory_space<vmem>>, vector<2x12xf32>
    tpu.vector_store %arg4[%c0_10, %c0_11], %17 {strides = array<i32>} : memref<2x12xf32, #tpu.memory_space<vmem>>, vector<2x12xf32>,
    return
  }
  func.func @transform_0(%arg0: i32) -> (i32, i32) {
    %c0_i32 = arith.constant 0 : i32
    %c0_i32_0 = arith.constant 0 : i32
    return %arg0, %c0_i32 : i32, i32
  }
  func.func @transform_1(%arg0: i32) -> (i32, i32, i32) {
    %c0_i32 = arith.constant 0 : i32
    %c0_i32_0 = arith.constant 0 : i32
    %c0_i32_1 = arith.constant 0 : i32
    return %arg0, %c0_i32, %c0_i32_0 : i32, i32, i32
  }
  func.func @transform_2(%arg0: i32) -> (i32, i32, i32) {
    %c0_i32 = arith.constant 0 : i32
    %c0_i32_0 = arith.constant 0 : i32
    %c0_i32_1 = arith.constant 0 : i32
    return %arg0, %c0_i32, %c0_i32_0 : i32, i32, i32
  }
  func.func @transform_3(%arg0: i32) -> (i32, i32) {
    %c0_i32 = arith.constant 0 : i32
    %c0_i32_0 = arith.constant 0 : i32
    return %arg0, %c0_i32 : i32, i32
  }
}

</mosaic_0001>

<bundles_post_ra>
// kernel: tpu_custom_call.1
= control target key start
LH: loop header
LB: loop body
LE: loop exit
PB: predicated region body
PF: predicated region fallthrough
CT: control target
= control target key end

     0   :  { %8 = vsyncpa [#allocation3], 0  ;;  %s385_s0 = inlined_call_operand.hbm [shape: f32[2,3], index: 0, kind: input, shape index: {}]   ;;  %s386_s1 = inlined_call_operand.hbm [shape: f32[2,4,256], index: 1, kind: input, shape index: {}]   ;;  %s387_s2 = inlined_call_operand.vmem [shape: f32[2,1,256], index: 2, kind: input, shape index: {}]   ;;  %s388_s3 = inlined_call_operand.hbm [shape: f32[2,12], index: 3, kind: output, shape index: {}]  }
   0x1   :  { %9 = vsyncpa [#allocation6], 0 }
   0x2   :  { %10 = vsyncpa [#allocation4], 0  ;;  %s292_s12 = smov [#allocation2]   ;;  %s293_s14 = smov [#allocation5]  }
   0x3   :  { %s17_s13 = sshll.u32 %s292_s12, 4  ;;  %s26_s15 = sshll.u32 %s293_s14, 4  ;;  %s18_s13 = int_to_ptr.vmem [resolvable:$true] %s17_s13  ;;  %s319_s15 = int_to_ptr.vmem [resolvable:$true] %s26_s15 }
   0x4   :  { %s220_s18 = scalar_lea.hbm %s385_s0, 32 }
   0x5   :  { %p221_p0 = scmp.ne.s32.totalorder %s385_s0, %s220_s18  ;;  %p224_p1 = scmp.lt.u32.totalorder %s220_s18, %s385_s0 }
   0x7   :  { %p226_p2 = pnand %p224_p1, %p221_p0 }
   0x9   :  { %229 = shalt.err (!%p226_p2)
}
   0xa   :  { %s230_s23 = scalar_lea.vmem %s18_s13, 32  ;;  %p235_p4 = scmp.lt.s32.totalorder %s18_s13, %s18_s13 }
   0xb   :  { %p231_p3 = scmp.ne.s32.totalorder %s18_s13, %s230_s23  ;;  %p236_p5 = scmp.lt.s32.totalorder %s230_s23, %s230_s23 }
   0xd   :  { %p237_p6 = por %p236_p5, %p235_p4 }
   0xf   :  { %p238_p7 = pnand %p237_p6, %p231_p3 }
  0x11   :  { %241 = shalt.err (!%p238_p7)
}
  0x12   :  { %20 = dma.hbm_to_vmem [thread:$0]  %s385_s0, 32, %s18_s13, [#allocation3]  }
  0x13   :  { %s242_s28 = scalar_lea.hbm %s386_s1, 256 }
  0x14   :  { %p243_p8 = scmp.ne.s32.totalorder %s386_s1, %s242_s28  ;;  %p246_p9 = scmp.lt.u32.totalorder %s242_s28, %s386_s1 }
  0x16   :  { %p248_p10 = pnand %p246_p9, %p243_p8 }
  0x18   :  { %251 = shalt.err (!%p248_p10)
}
  0x19   :  { %s252_s6 = scalar_lea.vmem %s319_s15, 256  ;;  %p257_p12 = scmp.lt.s32.totalorder %s319_s15, %s319_s15 }
  0x1a   :  { %p253_p11 = scmp.ne.s32.totalorder %s319_s15, %s252_s6  ;;  %p258_p13 = scmp.lt.s32.totalorder %s252_s6, %s252_s6 }
  0x1c   :  { %p259_p0 = por %p258_p13, %p257_p12 }
  0x1e   :  { %p260_p1 = pnand %p259_p0, %p253_p11 }
  0x20   :  { %263 = shalt.err (!%p260_p1)
}
  0x21   :  { %s294_s0 = smov 128   ;;  %s295_s7 = smov 8  }
  0x22   :  { %32 = dma.hbm_to_vmem [thread:$0]  %s386_s1, 256, %s319_s15, [#allocation6], %s294_s0, %s294_s0, %s295_s7  }
  0x23   :  { %286 = dma.done.wait [#allocation3], 32  }
  0x24   :  { %287 = vsyncadd [#allocation3], 4294967264 }
  0x25   :  { %288 = dma.done.wait [#allocation6], 256  }
  0x26   :  { %289 = vsyncadd [#allocation6], 4294967040  ;;  %v65_v0 = vlaneseq  ;;  %v296_v1 = vmov 0   ;;  %vm49_vm0 = vcmask 1043456   ;;  %v41_v3 = vld [vmem:[#allocation5] sm:$0xff]  ;;  %v42_v4 = vld [vmem:[#allocation5 + $0x8] sm:$0xff] }
  0x27   :  { %214 = vset.pattern.permute.xlu1 %v296_v1  ;;  %216 = vset.pattern.permute.xlu0 %v296_v1  ;;  %v60_v5 = vld [vmem:[#allocation2] sm:$0x3]  ;;  %v45_v7 = vcombine.high %v41_v3, %v41_v3  ;;  %v50_v8 = vsel %vm49_vm0, %v41_v3, 0.0  ;;  %v46_v9 = vcombine.high %v42_v4, %v42_v4  ;;  %v92_v11 = vld [vmem:[%s387_s2] sm:$0x3]  ;;  %v55_v13 = vsel %vm49_vm0, %v42_v4, 0.0 }
  0x28   :  { %v351_v2 = vshrl.u32 %v65_v0, 7  ;;  %63 = vperm.xlu1 %214, %v60_v5   ;;  %vm94_vm1 = vcmp.ne.f32.partialorder %v92_v11, 0.0  ;;  %v297_v17 = vmov 1   ;;  %v93_v26 = vld [vmem:[%s387_s2 + $0x2] sm:$0x3]  ;;  %v141_v47 = vand.u32 127, %v65_v0 }
  0x29   :  { %v51_v12 = vsel %vm49_vm0, %v45_v7, 0.0  ;;  %v56_v14 = vsel %vm49_vm0, %v46_v9, 0.0  ;;  %v96_v15 = vsel %vm94_vm1, 1, %v296_v1  ;;  %vm95_vm4 = vcmp.ne.f32.partialorder %v93_v26, 0.0  ;;  %s298_s2 = smov [#allocation7]  }
  0x2a   :  { %v67_v6 = vsub.s32 0, %v351_v2  ;;  %v71_v10 = vsub.s32 1, %v351_v2  ;;  %v52_v16 = vadd.f32 %v51_v12, %v50_v8  ;;  %v57_v20 = vadd.f32 %v56_v14, %v55_v13  ;;  %s197_s13 = sshll.u32 %s298_s2, 4  ;;  %s198_s13 = int_to_ptr.vmem [resolvable:$true] %s197_s13 }
  0x2b   :  { %v97_v27 = vsel %vm95_vm4, 1, %v296_v1  ;;  %v174_v49 = vadd.s32 4294967288, %v141_v47  ;;  %v161_v52 = vadd.s32 4294967292, %v141_v47  ;;  %v144_v56 = vsub.s32 %v141_v47, %v351_v2  ;;  %s264_s14 = scalar_lea.vmem %s198_s13, 32  ;;  %p269_p3 = scmp.lt.s32.totalorder %s198_s13, %s198_s13 }
  0x2c   :  { %215 = vset.pattern.permute.xlu1 %v297_v17  ;;  %v101_v18 = vrot.slane %v96_v15, %v67_v6  ;;  %v105_v19 = vrot.slane %v96_v15, %v71_v10  ;;  %53 = vadd.xlane.f32.xlu0 %v52_v16  ;;  %v109_v28 = vrot.slane %v97_v27, %v67_v6  ;;  %vm150_vm7 = vcmask 1041409   ;;  %p265_p2 = scmp.ne.s32.totalorder %s198_s13, %s264_s14  ;;  %p270_p4 = scmp.lt.s32.totalorder %s264_s14, %s264_s14 }
  0x2d   :  { %78 = vperm.xlu1 %215, %v60_v5   ;;  %v113_v29 = vrot.slane %v97_v27, %v71_v10  ;;  %v177_v53 = vsub.s32 %v174_v49, %v351_v2  ;;  %v164_v57 = vsub.s32 %v161_v52, %v351_v2  ;;  %vm185_vm8 = vcmask 31744  }
  0x2e   :  { %vm114_vm2 = vcmp.eq.s32.totalorder %v101_v18, 1  ;;  %vm115_vm3 = vcmp.eq.s32.totalorder %v105_v19, 1  ;;  %vm116_vm5 = vcmp.eq.s32.totalorder %v109_v28, 1  ;;  %vm187_vm9 = vcmask 64512   ;;  %p271_p5 = por %p270_p4, %p269_p3 }
  0x2f   :  { %v118_v21 = vsel %vm114_vm2, %v41_v3, -5000.0  ;;  %v119_v22 = vsel %vm115_vm3, %v45_v7, -5000.0  ;;  %vm117_vm6 = vcmp.eq.s32.totalorder %v113_v29, 1  ;;  %v120_v30 = vsel %vm116_vm5, %v42_v4, -5000.0 }
  0x30   :  { %v122_v23 = vsel %vm49_vm0, %v118_v21, -inf  ;;  %v123_v24 = vsel %vm49_vm0, %v119_v22, -inf  ;;  %58 = vadd.xlane.f32.xlu0 %v57_v20  ;;  %v121_v31 = vsel %vm117_vm6, %v46_v9, -5000.0  ;;  %v127_v32 = vsel %vm49_vm0, %v120_v30, -inf  ;;  %p272_p6 = pnand %p271_p5, %p265_p2 }
  0x31   :  { %v124_v25 = vmax.f32 %v122_v23, %v123_v24  ;;  %217 = vset.pattern.permute.xlu1 %v296_v1  ;;  %v128_v33 = vsel %vm49_vm0, %v121_v31, -inf  ;;  %vm189_vm10 = vcmask 91136  }
  0x32   :  { %v129_v34 = vmax.f32 %v127_v32, %v128_v33 }
  0x34   :  { %125 = vmax.xlane.f32.xlu0 %v124_v25 }
  0x51   :  { %130 = vmax.xlane.f32.xlu1 %v129_v34 }
  0xa7   :  { %v64_v35 = vpop.permute.xlu1 %63 }
  0xa8   :  { %v68_v36 = vrot.slane %v64_v35, %v67_v6  ;;  %v72_v41 = vrot.slane %v64_v35, %v71_v10 }
  0xac   :  { %v79_v37 = vpop.permute.xlu1 %78 }
  0xad   :  { %v83_v39 = vrot.slane %v79_v37, %v67_v6  ;;  %v87_v43 = vrot.slane %v79_v37, %v71_v10 }
  0xb9   :  { %v54_v38 = vpop.xlane.xlu0 %53 }
  0xba   :  { %v75_v40 = vmul.f32 %v68_v36, %v54_v38  ;;  %v90_v44 = vmul.f32 %v83_v39, %v54_v38 }
  0xbc   :  { %135 = vperm.xlu0 %216, %v75_v40  }
  0xbd   :  { %v59_v42 = vpop.xlane.xlu0 %58 }
  0xbe   :  { %v76_v45 = vmul.f32 %v72_v41, %v59_v42  ;;  %v91_v46 = vmul.f32 %v87_v43, %v59_v42 }
  0xc0   :  { %156 = vperm.xlu0 %216, %v90_v44   ;;  %138 = vperm.xlu1 %217, %v76_v45  }
  0xc1   :  { %v126_v48 = vpop.xlane.xlu0 %125 }
  0xc2   :  { %v178_v60 = vrot.slane %v126_v48, %v177_v53 }
  0xc4   :  { %159 = vperm.xlu0 %216, %v91_v46  }
  0xde   :  { %v131_v50 = vpop.xlane.xlu1 %130 }
  0xdf   :  { %v182_v59 = vrot.slane %v131_v50, %v177_v53 }
  0xe1   :  { %v183_v4 = vsel %vm150_vm7, %v182_v59, %v178_v60 }
 0x13b   :  { %v136_v51 = vpop.permute.xlu0 %135 }
 0x13c   :  { %v145_v62 = vrot.slane %v136_v51, %v144_v56 }
 0x13f   :  { %v139_v54 = vpop.permute.xlu1 %138  ;;  %v157_v55 = vpop.permute.xlu0 %156 }
 0x140   :  { %v149_v58 = vrot.slane %v139_v54, %v144_v56  ;;  %v165_v63 = vrot.slane %v157_v55, %v164_v57 }
 0x142   :  { %v151_v1 = vsel %vm150_vm7, %v149_v58, %v145_v62 }
 0x143   :  { %v160_v61 = vpop.permute.xlu0 %159 }
 0x144   :  { %v169_v0 = vrot.slane %v160_v61, %v164_v57 }
 0x146   :  { %v170_v3 = vsel %vm150_vm7, %v169_v0, %v165_v63 }
 0x147   :  { %v186_v5 = vsel %vm185_vm8, %v151_v1, %v170_v3 }
 0x148   :  { %v188_v6 = vsel %vm187_vm9, %v186_v5, %v183_v4 }
 0x149   :  { %190 = vst.msk [vmem:[#allocation7] sm:$0x3] %vm189_vm10, %v188_v6 }
 0x14a   :  { %275 = shalt.err (!%p272_p6)
}
 0x14b   :  { %s276_s17 = scalar_lea.hbm %s388_s3, 32 }
 0x14c   :  { %p277_p7 = scmp.ne.s32.totalorder %s388_s3, %s276_s17  ;;  %p280_p8 = scmp.lt.u32.totalorder %s276_s17, %s388_s3 }
 0x14e   :  { %p282_p9 = pnand %p280_p8, %p277_p7 }
 0x150   :  { %285 = shalt.err (!%p282_p9)
}
 0x151   :  { %200 = dma.vmem_to_hbm [thread:$0]  %s198_s13, 32, %s388_s3, [#allocation4]  }
 0x152   :  { %290 = dma.done.wait [#allocation4], 32  }
 0x153   :  { %291 = vsyncadd [#allocation4], 4294967264 }
 0x154   :  { %204 = vsyncpa [#allocation3], 1 }
 0x155   :  { %205 = vsyncpa [#allocation6], 1 }
 0x156   :  { %206 = vsyncpa [#allocation4], 1 }

</bundles_post_ra>
